<compile_context>
chip_gen: v7x
topology: tpu7x:2x2x1
jax: 0.10.0
libtpu: 0.0.40
codegen_flags: <defaults>
</compile_context>

<pallas_src>
import math
import functools

import jax
import jax.numpy as jnp
from jax.experimental import pallas as pl
from jax.experimental.pallas import tpu as pltpu


def _layer_norm(x, gamma, beta, eps=1e-5):
    mu = jnp.mean(x, axis=-1, keepdims=True)
    var = jnp.mean((x - mu) ** 2, axis=-1, keepdims=True)
    return (x - mu) * jax.lax.rsqrt(var + eps) * gamma + beta


def _decoder_layer_kernel(n_heads,
                          x_ref,
                          qkv_w_ref, qkv_b_ref, out_w_ref, out_b_ref,
                          g1_ref, b1_ref,
                          w1_ref, bb1_ref, w2_ref, bb2_ref,
                          g2_ref, b2_ref,
                          o_ref,
                          x_state, y_scr):
    l = pl.program_id(1)
    n_layers = pl.num_programs(1)

    # First layer for this batch element: load activations into the resident VMEM state.
    @pl.when(l == 0)
    def _():
        x_state[...] = x_ref[0].astype(jnp.float32)

    x = x_state[...]                       # (N, D) fp32, resident across layers
    N, D = x.shape
    H = n_heads
    S = D // H
    scale = 1.0 / math.sqrt(S)

    # ---- multi-head causal self-attention ----
    x_bf = x.astype(jnp.bfloat16)          # bf16 MXU operands, fp32 accumulation
    qkv = jnp.dot(x_bf, qkv_w_ref[0],
                  preferred_element_type=jnp.float32) + qkv_b_ref[0]
    q = qkv[:, :D] * scale                 # fold 1/sqrt(S) into q (touches N*S, not N*N)
    k = qkv[:, D:2 * D]
    v = qkv[:, 2 * D:]
    q_bf = q.astype(jnp.bfloat16)
    k_bf = k.astype(jnp.bfloat16)
    v_bf = v.astype(jnp.bfloat16)

    # Causal mask built in-kernel (cheap VPU iota/compare; no HBM mask traffic).
    row = jax.lax.broadcasted_iota(jnp.int32, (N, N), 0)
    col = jax.lax.broadcasted_iota(jnp.int32, (N, N), 1)
    neg_big = jnp.float32(-1e30)

    # q . k^T without materializing k^T: contract the last axis of both operands.
    contract_last = (((1,), (1,)), ((), ()))
    for h in range(H):                      # static slices; each head's (N,N) score
        sl = slice(h * S, (h + 1) * S)      # matrix dies after the scratch write below
        s = jax.lax.dot_general(q_bf[:, sl], k_bf[:, sl], contract_last,
                                preferred_element_type=jnp.float32)
        s = jnp.where(col > row, neg_big, s)
        s = s - jnp.max(s, axis=-1, keepdims=True)
        e = jnp.exp(s)
        p = e * pl.reciprocal(jnp.sum(e, axis=-1, keepdims=True), approx=True)
        # TODO(synk): attention dropout omitted (eval semantics).
        y_scr[:, sl] = jnp.dot(p.astype(jnp.bfloat16), v_bf[:, sl],
                               preferred_element_type=jnp.float32)

    attn = jnp.dot(y_scr[...].astype(jnp.bfloat16), out_w_ref[0],
                   preferred_element_type=jnp.float32) + out_b_ref[0]

    # post-norm residual block 1 (fp32 elementwise)
    x1 = _layer_norm(x + attn, g1_ref[0], b1_ref[0])

    # ---- feed forward: Linear -> ReLU -> Linear ----
    hdn = jnp.maximum(
        jnp.dot(x1.astype(jnp.bfloat16), w1_ref[0],
                preferred_element_type=jnp.float32) + bb1_ref[0], 0.0)
    ff = jnp.dot(hdn.astype(jnp.bfloat16), w2_ref[0],
                 preferred_element_type=jnp.float32) + bb2_ref[0]

    # post-norm residual block 2
    x2 = _layer_norm(x1 + ff, g2_ref[0], b2_ref[0])
    x_state[...] = x2                       # carry to next layer (stays in VMEM)

    @pl.when(l == n_layers - 1)
    def _():
        o_ref[0] = x2.astype(o_ref.dtype)


@functools.partial(jax.jit, static_argnames=("n_heads",))
def transformer_decoder_pallas(x, layer_params, *, n_heads):
    """Fused decoder: grid = (batch, layer); activations resident in VMEM across layers."""
    B, N, D = x.shape
    L = len(layer_params)
    F = layer_params[0]["w1"].shape[-1]

    names = ["qkv_w", "qkv_b", "out_w", "out_b", "g1", "b1",
             "w1", "bb1", "w2", "bb2", "g2", "b2"]
    mat_names = {"qkv_w", "out_w", "w1", "w2"}
    stacked = []
    for nme in names:
        w = jnp.stack([p[nme] for p in layer_params], axis=0)       # (L, ...)
        if nme in mat_names:
            w = w.astype(jnp.bfloat16)      # cast once outside the kernel (bf16 MXU operands)
        stacked.append(w)

    def w_spec(w):
        blk = (1,) + w.shape[1:]            # one layer's tensor per grid step
        return pl.BlockSpec(blk, lambda b, l: (l,) + (0,) * (w.ndim - 1))

    # Explicit VMEM budget: double-buffered bf16 weight mats + fp32 small params +
    # resident activations / scores / scratch, with headroom (capped for v7x's 64 MiB).
    wbytes = 2 * 2 * (D * 3 * D + D * D + D * F + F * D)
    pbytes = 2 * 4 * (3 * D + 6 * D + F)
    abytes = 4 * (6 * N * D + N * N + 3 * N * D + N * F)
    vmem_limit = int(min(64 * 2 ** 20, max(16 * 2 ** 20, 4 * (wbytes + pbytes + abytes))))

    # TODO(synk): for long sequences add a query-tile grid axis with flash-style
    # key-block iteration so (N, N) scores never fully materialize in VMEM.
    kernel = functools.partial(_decoder_layer_kernel, n_heads)
    return pl.pallas_call(
        kernel,
        out_shape=jax.ShapeDtypeStruct((B, N, D), x.dtype),
        grid_spec=pltpu.PrefetchScalarGridSpec(
            num_scalar_prefetch=0,
            grid=(B, L),
            in_specs=[pl.BlockSpec((1, N, D), lambda b, l: (b, 0, 0))]
                     + [w_spec(w) for w in stacked],
            out_specs=pl.BlockSpec((1, N, D), lambda b, l: (b, 0, 0)),
            scratch_shapes=[pltpu.VMEM((N, D), jnp.float32),   # resident activations
                            pltpu.VMEM((N, D), jnp.float32)],  # attention head outputs
        ),
        compiler_params=pltpu.CompilerParams(
            dimension_semantics=("parallel", "arbitrary"),
            vmem_limit_bytes=vmem_limit,
        ),
    )(x, *stacked)


# ------------------------- parameters / reference -------------------------

def init_params(key, n_layers, d_model, d_ff):
    """Deterministic init mirroring ParameterInit: xavier_uniform for matrices,
    zeros for biases, ones/zeros for LayerNorm affine params."""
    def xavier(k, shape):
        fan_in, fan_out = shape
        bound = math.sqrt(6.0 / (fan_in + fan_out))
        return jax.random.uniform(k, shape, jnp.float32, -bound, bound)

    layers = []
    for l in range(n_layers):
        ks = jax.random.split(jax.random.fold_in(key, l), 4)
        layers.append(dict(
            qkv_w=xavier(ks[0], (d_model, 3 * d_model)),
            qkv_b=jnp.zeros((1, 3 * d_model), jnp.float32),
            out_w=xavier(ks[1], (d_model, d_model)),
            out_b=jnp.zeros((1, d_model), jnp.float32),
            g1=jnp.ones((1, d_model), jnp.float32),
            b1=jnp.zeros((1, d_model), jnp.float32),
            w1=xavier(ks[2], (d_model, d_ff)),
            bb1=jnp.zeros((1, d_ff), jnp.float32),
            w2=xavier(ks[3], (d_ff, d_model)),
            bb2=jnp.zeros((1, d_model), jnp.float32),
            g2=jnp.ones((1, d_model), jnp.float32),
            b2=jnp.zeros((1, d_model), jnp.float32),
        ))
    return layers


def transformer_decoder_reference(x, layer_params, n_heads):
    """Pure-JAX mirror (eval mode) using the same bf16-operand / fp32-accumulate matmuls."""
    B, N, D = x.shape
    H = n_heads
    S = D // H
    causal = jnp.triu(jnp.ones((N, N), dtype=bool), k=1)
    for p in layer_params:
        qkv_w = p["qkv_w"].astype(jnp.bfloat16)
        out_w = p["out_w"].astype(jnp.bfloat16)
        w1 = p["w1"].astype(jnp.bfloat16)
        w2 = p["w2"].astype(jnp.bfloat16)
        qkv = jnp.dot(x.astype(jnp.bfloat16), qkv_w,
                      preferred_element_type=jnp.float32) + p["qkv_b"]
        q, k, v = jnp.split(qkv, 3, axis=-1)
        q = q / math.sqrt(S)
        to_heads = lambda z: z.reshape(B, N, H, S).transpose(0, 2, 1, 3).astype(jnp.bfloat16)
        qh, kh, vh = to_heads(q), to_heads(k), to_heads(v)
        a = jnp.einsum('bhqs,bhks->bhqk', qh, kh, preferred_element_type=jnp.float32)
        a = jnp.where(causal[None, None], jnp.float32(-1e30), a)
        a = jax.nn.softmax(a, axis=-1)
        y = jnp.einsum('bhqk,bhks->bhqs', a.astype(jnp.bfloat16), vh,
                       preferred_element_type=jnp.float32)
        y = y.transpose(0, 2, 1, 3).reshape(B, N, D)
        attn = jnp.dot(y.astype(jnp.bfloat16), out_w,
                       preferred_element_type=jnp.float32) + p["out_b"]
        x1 = _layer_norm(x + attn, p["g1"], p["b1"])
        hdn = jnp.maximum(jnp.dot(x1.astype(jnp.bfloat16), w1,
                                  preferred_element_type=jnp.float32) + p["bb1"], 0.0)
        ff = jnp.dot(hdn.astype(jnp.bfloat16), w2,
                     preferred_element_type=jnp.float32) + p["bb2"]
        x = _layer_norm(x1 + ff, p["g2"], p["b2"])
    return x


if __name__ == "__main__":
    B, N, D, H, F, L = 2, 8, 32, 4, 64, 2   # batch, seq(max_len), d_model, n_heads, d_ff, n_layers

    key = jax.random.PRNGKey(0)
    k_x, k_p = jax.random.split(key)
    x = jax.random.normal(k_x, (B, N, D), jnp.float32)
    params = init_params(k_p, L, D, F)

    out = transformer_decoder_pallas(x, params, n_heads=H)
    out = jax.block_until_ready(out)

    ref = transformer_decoder_reference(x, params, H)
    assert out.shape == (B, N, D)
    max_err = float(jnp.max(jnp.abs(out - ref)))
    assert jnp.allclose(out, ref, atol=2e-2, rtol=2e-2), f"mismatch vs reference (max abs err {max_err})"

    print("KERNEL_OK")
</pallas_src>

<mosaic_0001>
module attributes {stable_mosaic.version = 11 : i64} {
  func.func @_decoder_layer_kernel(%arg0: i32, %arg1: i32, %arg2: memref<1x8x32xf32, #tpu.memory_space<vmem>>, %arg3: memref<1x32x96xbf16, #tpu.memory_space<vmem>>, %arg4: memref<1x1x96xf32, #tpu.memory_space<vmem>>, %arg5: memref<1x32x32xbf16, #tpu.memory_space<vmem>>, %arg6: memref<1x1x32xf32, #tpu.memory_space<vmem>>, %arg7: memref<1x1x32xf32, #tpu.memory_space<vmem>>, %arg8: memref<1x1x32xf32, #tpu.memory_space<vmem>>, %arg9: memref<1x32x64xbf16, #tpu.memory_space<vmem>>, %arg10: memref<1x1x64xf32, #tpu.memory_space<vmem>>, %arg11: memref<1x64x32xbf16, #tpu.memory_space<vmem>>, %arg12: memref<1x1x32xf32, #tpu.memory_space<vmem>>, %arg13: memref<1x1x32xf32, #tpu.memory_space<vmem>>, %arg14: memref<1x1x32xf32, #tpu.memory_space<vmem>>, %arg15: memref<1x8x32xf32, #tpu.memory_space<vmem>>, %arg16: memref<8x32xf32, #tpu.memory_space<vmem>>, %arg17: memref<8x32xf32, #tpu.memory_space<vmem>>) attributes {dimension_semantics = [#tpu.dimension_semantics<parallel>, #tpu.dimension_semantics<arbitrary>], iteration_bounds = array<i64: 2, 2>, scalar_prefetch = 0 : i64, scratch_operands = 2 : i64, tpu.core_type = #tpu.core_type<tc>, window_params = [{transform_indices = @transform_0, window_bounds = array<i64: 1, 8, 32>}, {transform_indices = @transform_1, window_bounds = array<i64: 1, 32, 96>}, {transform_indices = @transform_2, window_bounds = array<i64: 1, 1, 96>}, {transform_indices = @transform_3, window_bounds = array<i64: 1, 32, 32>}, {transform_indices = @transform_4, window_bounds = array<i64: 1, 1, 32>}, {transform_indices = @transform_5, window_bounds = array<i64: 1, 1, 32>}, {transform_indices = @transform_6, window_bounds = array<i64: 1, 1, 32>}, {transform_indices = @transform_7, window_bounds = array<i64: 1, 32, 64>}, {transform_indices = @transform_8, window_bounds = array<i64: 1, 1, 64>}, {transform_indices = @transform_9, window_bounds = array<i64: 1, 64, 32>}, {transform_indices = @transform_10, window_bounds = array<i64: 1, 1, 32>}, {transform_indices = @transform_11, window_bounds = array<i64: 1, 1, 32>}, {transform_indices = @transform_12, window_bounds = array<i64: 1, 1, 32>}, {transform_indices = @transform_13, window_bounds = array<i64: 1, 8, 32>}]} {
    %c0_i32 = arith.constant 0 : i32
    %0 = arith.cmpi eq, %arg1, %c0_i32 : i32
    %1 = arith.extui %0 : i1 to i32
    %c0_i32_0 = arith.constant 0 : i32
    %2 = arith.cmpi ne, %1, %c0_i32_0 : i32
    scf.if %2 {
      %c0_83 = arith.constant 0 : index
      %c0_84 = arith.constant 0 : index
      %c0_85 = arith.constant 0 : index
      %187 = vector.load %arg2[%c0_83, %c0_84, %c0_85] : memref<1x8x32xf32, #tpu.memory_space<vmem>>, vector<1x8x32xf32>
      %188 = vector.shape_cast %187 : vector<1x8x32xf32> to vector<8x32xf32>
      %c0_86 = arith.constant 0 : index
      %c0_87 = arith.constant 0 : index
      %189 = vector.load %arg16[%c0_86, %c0_87] : memref<8x32xf32, #tpu.memory_space<vmem>>, vector<8x32xf32>
      tpu.vector_store %arg16[%c0_86, %c0_87], %188 {strides = array<i32>} : memref<8x32xf32, #tpu.memory_space<vmem>>, vector<8x32xf32>,
    } else {
    }
    %c0 = arith.constant 0 : index
    %c0_1 = arith.constant 0 : index
    %3 = vector.load %arg16[%c0, %c0_1] : memref<8x32xf32, #tpu.memory_space<vmem>>, vector<8x32xf32>
    %4 = arith.truncf %3 : vector<8x32xf32> to vector<8x32xbf16>
    %c0_2 = arith.constant 0 : index
    %c0_3 = arith.constant 0 : index
    %c0_4 = arith.constant 0 : index
    %5 = vector.load %arg3[%c0_2, %c0_3, %c0_4] : memref<1x32x96xbf16, #tpu.memory_space<vmem>>, vector<1x32x96xbf16>
    %6 = vector.shape_cast %5 : vector<1x32x96xbf16> to vector<32x96xbf16>
    %cst = arith.constant dense<0.000000e+00> : vector<8x96xf32>
    %7 = tpu.matmul %4, %6, %cst {dimension_numbers = #tpu.dot_dimension_numbers<[1], [0], [0], [1], [0, 0, 1, 1], [], []>} : vector<8x32xbf16>, vector<32x96xbf16>, vector<8x96xf32> -> vector<8x96xf32>
    %c0_5 = arith.constant 0 : index
    %c0_6 = arith.constant 0 : index
    %c0_7 = arith.constant 0 : index
    %8 = vector.load %arg4[%c0_5, %c0_6, %c0_7] : memref<1x1x96xf32, #tpu.memory_space<vmem>>, vector<1x1x96xf32>
    %9 = vector.shape_cast %8 : vector<1x1x96xf32> to vector<1x96xf32>
    %10 = vector.broadcast %9 : vector<1x96xf32> to vector<8x96xf32>
    %11 = arith.addf %7, %10 : vector<8x96xf32>
    %12 = vector.extract_strided_slice %11 {offsets = [0, 0], sizes = [8, 32], strides = [1, 1]} : vector<8x96xf32> to vector<8x32xf32>
    %cst_8 = arith.constant 0.353553385 : f32
    %13 = vector.broadcast %cst_8 : f32 to vector<8x32xf32>
    %14 = arith.mulf %12, %13 : vector<8x32xf32>
    %15 = vector.extract_strided_slice %11 {offsets = [0, 32], sizes = [8, 32], strides = [1, 1]} : vector<8x96xf32> to vector<8x32xf32>
    %16 = vector.extract_strided_slice %11 {offsets = [0, 64], sizes = [8, 32], strides = [1, 1]} : vector<8x96xf32> to vector<8x32xf32>
    %17 = arith.truncf %14 : vector<8x32xf32> to vector<8x32xbf16>
    %18 = arith.truncf %15 : vector<8x32xf32> to vector<8x32xbf16>
    %19 = arith.truncf %16 : vector<8x32xf32> to vector<8x32xbf16>
    %20 = tpu.iota {dimensions = array<i32: 0>} : vector<8x8xi32>
    %21 = tpu.iota {dimensions = array<i32: 1>} : vector<8x8xi32>
    %22 = vector.extract_strided_slice %17 {offsets = [0, 0], sizes = [8, 8], strides = [1, 1]} : vector<8x32xbf16> to vector<8x8xbf16>
    %23 = vector.extract_strided_slice %18 {offsets = [0, 0], sizes = [8, 8], strides = [1, 1]} : vector<8x32xbf16> to vector<8x8xbf16>
    %cst_9 = arith.constant dense<0.000000e+00> : vector<8x8xf32>
    %24 = tpu.matmul %22, %23, %cst_9 {dimension_numbers = #tpu.dot_dimension_numbers<[1], [1], [0], [0], [0, 0, 1, 0], [], []>} : vector<8x8xbf16>, vector<8x8xbf16>, vector<8x8xf32> -> vector<8x8xf32>
    %25 = arith.cmpi sgt, %21, %20 : vector<8x8xi32>
    %cst_10 = arith.constant -1.000000e+30 : f32
    %26 = vector.broadcast %cst_10 : f32 to vector<8x8xf32>
    %27 = arith.select %25, %26, %24 : vector<8x8xi1>, vector<8x8xf32>
    %cst_11 = arith.constant dense<0xFF800000> : vector<8xf32>
    %28 = vector.multi_reduction <maximumf>, %27, %cst_11 [1] : vector<8x8xf32> to vector<8xf32>
    %29 = vector.shape_cast %28 : vector<8xf32> to vector<8x1xf32>
    %30 = vector.broadcast %29 : vector<8x1xf32> to vector<8x8xf32>
    %31 = arith.subf %27, %30 : vector<8x8xf32>
    %32 = math.exp %31 : vector<8x8xf32>
    %cst_12 = arith.constant dense<0.000000e+00> : vector<8xf32>
    %33 = vector.multi_reduction <add>, %32, %cst_12 [1] : vector<8x8xf32> to vector<8xf32>
    %34 = vector.shape_cast %33 : vector<8xf32> to vector<8x1xf32>
    %35 = tpu.reciprocal %34 {approx = true} : vector<8x1xf32> -> vector<8x1xf32>
    %36 = vector.broadcast %35 : vector<8x1xf32> to vector<8x8xf32>
    %37 = arith.mulf %32, %36 : vector<8x8xf32>
    %38 = arith.truncf %37 : vector<8x8xf32> to vector<8x8xbf16>
    %39 = vector.extract_strided_slice %19 {offsets = [0, 0], sizes = [8, 8], strides = [1, 1]} : vector<8x32xbf16> to vector<8x8xbf16>
    %cst_13 = arith.constant dense<0.000000e+00> : vector<8x8xf32>
    %40 = tpu.matmul %38, %39, %cst_13 {dimension_numbers = #tpu.dot_dimension_numbers<[1], [0], [0], [1], [0, 0, 1, 1], [], []>} : vector<8x8xbf16>, vector<8x8xbf16>, vector<8x8xf32> -> vector<8x8xf32>
    %c0_14 = arith.constant 0 : index
    %c0_15 = arith.constant 0 : index
    %41 = vector.load %arg17[%c0_14, %c0_15] : memref<8x32xf32, #tpu.memory_space<vmem>>, vector<8x8xf32>
    tpu.vector_store %arg17[%c0_14, %c0_15], %40 {strides = array<i32>} : memref<8x32xf32, #tpu.memory_space<vmem>>, vector<8x8xf32>,
    %42 = vector.extract_strided_slice %17 {offsets = [0, 8], sizes = [8, 8], strides = [1, 1]} : vector<8x32xbf16> to vector<8x8xbf16>
    %43 = vector.extract_strided_slice %18 {offsets = [0, 8], sizes = [8, 8], strides = [1, 1]} : vector<8x32xbf16> to vector<8x8xbf16>
    %cst_16 = arith.constant dense<0.000000e+00> : vector<8x8xf32>
    %44 = tpu.matmul %42, %43, %cst_16 {dimension_numbers = #tpu.dot_dimension_numbers<[1], [1], [0], [0], [0, 0, 1, 0], [], []>} : vector<8x8xbf16>, vector<8x8xbf16>, vector<8x8xf32> -> vector<8x8xf32>
    %45 = arith.cmpi sgt, %21, %20 : vector<8x8xi32>
    %cst_17 = arith.constant -1.000000e+30 : f32
    %46 = vector.broadcast %cst_17 : f32 to vector<8x8xf32>
    %47 = arith.select %45, %46, %44 : vector<8x8xi1>, vector<8x8xf32>
    %cst_18 = arith.constant dense<0xFF800000> : vector<8xf32>
    %48 = vector.multi_reduction <maximumf>, %47, %cst_18 [1] : vector<8x8xf32> to vector<8xf32>
    %49 = vector.shape_cast %48 : vector<8xf32> to vector<8x1xf32>
    %50 = vector.broadcast %49 : vector<8x1xf32> to vector<8x8xf32>
    %51 = arith.subf %47, %50 : vector<8x8xf32>
    %52 = math.exp %51 : vector<8x8xf32>
    %cst_19 = arith.constant dense<0.000000e+00> : vector<8xf32>
    %53 = vector.multi_reduction <add>, %52, %cst_19 [1] : vector<8x8xf32> to vector<8xf32>
    %54 = vector.shape_cast %53 : vector<8xf32> to vector<8x1xf32>
    %55 = tpu.reciprocal %54 {approx = true} : vector<8x1xf32> -> vector<8x1xf32>
    %56 = vector.broadcast %55 : vector<8x1xf32> to vector<8x8xf32>
    %57 = arith.mulf %52, %56 : vector<8x8xf32>
    %58 = arith.truncf %57 : vector<8x8xf32> to vector<8x8xbf16>
    %59 = vector.extract_strided_slice %19 {offsets = [0, 8], sizes = [8, 8], strides = [1, 1]} : vector<8x32xbf16> to vector<8x8xbf16>
    %cst_20 = arith.constant dense<0.000000e+00> : vector<8x8xf32>
    %60 = tpu.matmul %58, %59, %cst_20 {dimension_numbers = #tpu.dot_dimension_numbers<[1], [0], [0], [1], [0, 0, 1, 1], [], []>} : vector<8x8xbf16>, vector<8x8xbf16>, vector<8x8xf32> -> vector<8x8xf32>
    %c0_21 = arith.constant 0 : index
    %c8 = arith.constant 8 : index
    %61 = vector.load %arg17[%c0_21, %c8] : memref<8x32xf32, #tpu.memory_space<vmem>>, vector<8x8xf32>
    tpu.vector_store %arg17[%c0_21, %c8], %60 {strides = array<i32>} : memref<8x32xf32, #tpu.memory_space<vmem>>, vector<8x8xf32>,
    %62 = vector.extract_strided_slice %17 {offsets = [0, 16], sizes = [8, 8], strides = [1, 1]} : vector<8x32xbf16> to vector<8x8xbf16>
    %63 = vector.extract_strided_slice %18 {offsets = [0, 16], sizes = [8, 8], strides = [1, 1]} : vector<8x32xbf16> to vector<8x8xbf16>
    %cst_22 = arith.constant dense<0.000000e+00> : vector<8x8xf32>
    %64 = tpu.matmul %62, %63, %cst_22 {dimension_numbers = #tpu.dot_dimension_numbers<[1], [1], [0], [0], [0, 0, 1, 0], [], []>} : vector<8x8xbf16>, vector<8x8xbf16>, vector<8x8xf32> -> vector<8x8xf32>
    %65 = arith.cmpi sgt, %21, %20 : vector<8x8xi32>
    %cst_23 = arith.constant -1.000000e+30 : f32
    %66 = vector.broadcast %cst_23 : f32 to vector<8x8xf32>
    %67 = arith.select %65, %66, %64 : vector<8x8xi1>, vector<8x8xf32>
    %cst_24 = arith.constant dense<0xFF800000> : vector<8xf32>
    %68 = vector.multi_reduction <maximumf>, %67, %cst_24 [1] : vector<8x8xf32> to vector<8xf32>
    %69 = vector.shape_cast %68 : vector<8xf32> to vector<8x1xf32>
    %70 = vector.broadcast %69 : vector<8x1xf32> to vector<8x8xf32>
    %71 = arith.subf %67, %70 : vector<8x8xf32>
    %72 = math.exp %71 : vector<8x8xf32>
    %cst_25 = arith.constant dense<0.000000e+00> : vector<8xf32>
    %73 = vector.multi_reduction <add>, %72, %cst_25 [1] : vector<8x8xf32> to vector<8xf32>
    %74 = vector.shape_cast %73 : vector<8xf32> to vector<8x1xf32>
    %75 = tpu.reciprocal %74 {approx = true} : vector<8x1xf32> -> vector<8x1xf32>
    %76 = vector.broadcast %75 : vector<8x1xf32> to vector<8x8xf32>
    %77 = arith.mulf %72, %76 : vector<8x8xf32>
    %78 = arith.truncf %77 : vector<8x8xf32> to vector<8x8xbf16>
    %79 = vector.extract_strided_slice %19 {offsets = [0, 16], sizes = [8, 8], strides = [1, 1]} : vector<8x32xbf16> to vector<8x8xbf16>
    %cst_26 = arith.constant dense<0.000000e+00> : vector<8x8xf32>
    %80 = tpu.matmul %78, %79, %cst_26 {dimension_numbers = #tpu.dot_dimension_numbers<[1], [0], [0], [1], [0, 0, 1, 1], [], []>} : vector<8x8xbf16>, vector<8x8xbf16>, vector<8x8xf32> -> vector<8x8xf32>
    %c0_27 = arith.constant 0 : index
    %c16 = arith.constant 16 : index
    %81 = vector.load %arg17[%c0_27, %c16] : memref<8x32xf32, #tpu.memory_space<vmem>>, vector<8x8xf32>
    tpu.vector_store %arg17[%c0_27, %c16], %80 {strides = array<i32>} : memref<8x32xf32, #tpu.memory_space<vmem>>, vector<8x8xf32>,
    %82 = vector.extract_strided_slice %17 {offsets = [0, 24], sizes = [8, 8], strides = [1, 1]} : vector<8x32xbf16> to vector<8x8xbf16>
    %83 = vector.extract_strided_slice %18 {offsets = [0, 24], sizes = [8, 8], strides = [1, 1]} : vector<8x32xbf16> to vector<8x8xbf16>
    %cst_28 = arith.constant dense<0.000000e+00> : vector<8x8xf32>
    %84 = tpu.matmul %82, %83, %cst_28 {dimension_numbers = #tpu.dot_dimension_numbers<[1], [1], [0], [0], [0, 0, 1, 0], [], []>} : vector<8x8xbf16>, vector<8x8xbf16>, vector<8x8xf32> -> vector<8x8xf32>
    %85 = arith.cmpi sgt, %21, %20 : vector<8x8xi32>
    %cst_29 = arith.constant -1.000000e+30 : f32
    %86 = vector.broadcast %cst_29 : f32 to vector<8x8xf32>
    %87 = arith.select %85, %86, %84 : vector<8x8xi1>, vector<8x8xf32>
    %cst_30 = arith.constant dense<0xFF800000> : vector<8xf32>
    %88 = vector.multi_reduction <maximumf>, %87, %cst_30 [1] : vector<8x8xf32> to vector<8xf32>
    %89 = vector.shape_cast %88 : vector<8xf32> to vector<8x1xf32>
    %90 = vector.broadcast %89 : vector<8x1xf32> to vector<8x8xf32>
    %91 = arith.subf %87, %90 : vector<8x8xf32>
    %92 = math.exp %91 : vector<8x8xf32>
    %cst_31 = arith.constant dense<0.000000e+00> : vector<8xf32>
    %93 = vector.multi_reduction <add>, %92, %cst_31 [1] : vector<8x8xf32> to vector<8xf32>
    %94 = vector.shape_cast %93 : vector<8xf32> to vector<8x1xf32>
    %95 = tpu.reciprocal %94 {approx = true} : vector<8x1xf32> -> vector<8x1xf32>
    %96 = vector.broadcast %95 : vector<8x1xf32> to vector<8x8xf32>
    %97 = arith.mulf %92, %96 : vector<8x8xf32>
    %98 = arith.truncf %97 : vector<8x8xf32> to vector<8x8xbf16>
    %99 = vector.extract_strided_slice %19 {offsets = [0, 24], sizes = [8, 8], strides = [1, 1]} : vector<8x32xbf16> to vector<8x8xbf16>
    %cst_32 = arith.constant dense<0.000000e+00> : vector<8x8xf32>
    %100 = tpu.matmul %98, %99, %cst_32 {dimension_numbers = #tpu.dot_dimension_numbers<[1], [0], [0], [1], [0, 0, 1, 1], [], []>} : vector<8x8xbf16>, vector<8x8xbf16>, vector<8x8xf32> -> vector<8x8xf32>
    %c0_33 = arith.constant 0 : index
    %c24 = arith.constant 24 : index
    %101 = vector.load %arg17[%c0_33, %c24] : memref<8x32xf32, #tpu.memory_space<vmem>>, vector<8x8xf32>
    tpu.vector_store %arg17[%c0_33, %c24], %100 {strides = array<i32>} : memref<8x32xf32, #tpu.memory_space<vmem>>, vector<8x8xf32>,
    %c0_34 = arith.constant 0 : index
    %c0_35 = arith.constant 0 : index
    %102 = vector.load %arg17[%c0_34, %c0_35] : memref<8x32xf32, #tpu.memory_space<vmem>>, vector<8x32xf32>
    %103 = arith.truncf %102 : vector<8x32xf32> to vector<8x32xbf16>
    %c0_36 = arith.constant 0 : index
    %c0_37 = arith.constant 0 : index
    %c0_38 = arith.constant 0 : index
    %104 = vector.load %arg5[%c0_36, %c0_37, %c0_38] : memref<1x32x32xbf16, #tpu.memory_space<vmem>>, vector<1x32x32xbf16>
    %105 = vector.shape_cast %104 : vector<1x32x32xbf16> to vector<32x32xbf16>
    %cst_39 = arith.constant dense<0.000000e+00> : vector<8x32xf32>
    %106 = tpu.matmul %103, %105, %cst_39 {dimension_numbers = #tpu.dot_dimension_numbers<[1], [0], [0], [1], [0, 0, 1, 1], [], []>} : vector<8x32xbf16>, vector<32x32xbf16>, vector<8x32xf32> -> vector<8x32xf32>
    %c0_40 = arith.constant 0 : index
    %c0_41 = arith.constant 0 : index
    %c0_42 = arith.constant 0 : index
    %107 = vector.load %arg6[%c0_40, %c0_41, %c0_42] : memref<1x1x32xf32, #tpu.memory_space<vmem>>, vector<1x1x32xf32>
    %108 = vector.shape_cast %107 : vector<1x1x32xf32> to vector<1x32xf32>
    %109 = vector.broadcast %108 : vector<1x32xf32> to vector<8x32xf32>
    %110 = arith.addf %106, %109 : vector<8x32xf32>
    %111 = arith.addf %3, %110 : vector<8x32xf32>
    %c0_43 = arith.constant 0 : index
    %c0_44 = arith.constant 0 : index
    %c0_45 = arith.constant 0 : index
    %112 = vector.load %arg7[%c0_43, %c0_44, %c0_45] : memref<1x1x32xf32, #tpu.memory_space<vmem>>, vector<1x1x32xf32>
    %113 = vector.shape_cast %112 : vector<1x1x32xf32> to vector<1x32xf32>
    %c0_46 = arith.constant 0 : index
    %c0_47 = arith.constant 0 : index
    %c0_48 = arith.constant 0 : index
    %114 = vector.load %arg8[%c0_46, %c0_47, %c0_48] : memref<1x1x32xf32, #tpu.memory_space<vmem>>, vector<1x1x32xf32>
    %115 = vector.shape_cast %114 : vector<1x1x32xf32> to vector<1x32xf32>
    %cst_49 = arith.constant dense<0.000000e+00> : vector<8xf32>
    %116 = vector.multi_reduction <add>, %111, %cst_49 [1] : vector<8x32xf32> to vector<8xf32>
    %117 = vector.shape_cast %116 : vector<8xf32> to vector<8x1xf32>
    %cst_50 = arith.constant 3.200000e+01 : f32
    %118 = vector.broadcast %cst_50 : f32 to vector<8x1xf32>
    %119 = arith.divf %117, %118 : vector<8x1xf32>
    %120 = vector.broadcast %119 : vector<8x1xf32> to vector<8x32xf32>
    %121 = arith.subf %111, %120 : vector<8x32xf32>
    %122 = arith.mulf %121, %121 : vector<8x32xf32>
    %cst_51 = arith.constant dense<0.000000e+00> : vector<8xf32>
    %123 = vector.multi_reduction <add>, %122, %cst_51 [1] : vector<8x32xf32> to vector<8xf32>
    %124 = vector.shape_cast %123 : vector<8xf32> to vector<8x1xf32>
    %cst_52 = arith.constant 3.200000e+01 : f32
    %125 = vector.broadcast %cst_52 : f32 to vector<8x1xf32>
    %126 = arith.divf %124, %125 : vector<8x1xf32>
    %127 = vector.broadcast %119 : vector<8x1xf32> to vector<8x32xf32>
    %128 = arith.subf %111, %127 : vector<8x32xf32>
    %cst_53 = arith.constant 9.99999974E-6 : f32
    %129 = vector.broadcast %cst_53 : f32 to vector<8x1xf32>
    %130 = arith.addf %126, %129 : vector<8x1xf32>
    %131 = math.rsqrt %130 : vector<8x1xf32>
    %132 = vector.broadcast %131 : vector<8x1xf32> to vector<8x32xf32>
    %133 = arith.mulf %128, %132 : vector<8x32xf32>
    %134 = vector.broadcast %113 : vector<1x32xf32> to vector<8x32xf32>
    %135 = arith.mulf %133, %134 : vector<8x32xf32>
    %136 = vector.broadcast %115 : vector<1x32xf32> to vector<8x32xf32>
    %137 = arith.addf %135, %136 : vector<8x32xf32>
    %138 = arith.truncf %137 : vector<8x32xf32> to vector<8x32xbf16>
    %c0_54 = arith.constant 0 : index
    %c0_55 = arith.constant 0 : index
    %c0_56 = arith.constant 0 : index
    %139 = vector.load %arg9[%c0_54, %c0_55, %c0_56] : memref<1x32x64xbf16, #tpu.memory_space<vmem>>, vector<1x32x64xbf16>
    %140 = vector.shape_cast %139 : vector<1x32x64xbf16> to vector<32x64xbf16>
    %cst_57 = arith.constant dense<0.000000e+00> : vector<8x64xf32>
    %141 = tpu.matmul %138, %140, %cst_57 {dimension_numbers = #tpu.dot_dimension_numbers<[1], [0], [0], [1], [0, 0, 1, 1], [], []>} : vector<8x32xbf16>, vector<32x64xbf16>, vector<8x64xf32> -> vector<8x64xf32>
    %c0_58 = arith.constant 0 : index
    %c0_59 = arith.constant 0 : index
    %c0_60 = arith.constant 0 : index
    %142 = vector.load %arg10[%c0_58, %c0_59, %c0_60] : memref<1x1x64xf32, #tpu.memory_space<vmem>>, vector<1x1x64xf32>
    %143 = vector.shape_cast %142 : vector<1x1x64xf32> to vector<1x64xf32>
    %144 = vector.broadcast %143 : vector<1x64xf32> to vector<8x64xf32>
    %145 = arith.addf %141, %144 : vector<8x64xf32>
    %cst_61 = arith.constant 0.000000e+00 : f32
    %146 = vector.broadcast %cst_61 : f32 to vector<8x64xf32>
    %147 = arith.maximumf %145, %146 : vector<8x64xf32>
    %148 = arith.truncf %147 : vector<8x64xf32> to vector<8x64xbf16>
    %c0_62 = arith.constant 0 : index
    %c0_63 = arith.constant 0 : index
    %c0_64 = arith.constant 0 : index
    %149 = vector.load %arg11[%c0_62, %c0_63, %c0_64] : memref<1x64x32xbf16, #tpu.memory_space<vmem>>, vector<1x64x32xbf16>
    %150 = vector.shape_cast %149 : vector<1x64x32xbf16> to vector<64x32xbf16>
    %cst_65 = arith.constant dense<0.000000e+00> : vector<8x32xf32>
    %151 = tpu.matmul %148, %150, %cst_65 {dimension_numbers = #tpu.dot_dimension_numbers<[1], [0], [0], [1], [0, 0, 1, 1], [], []>} : vector<8x64xbf16>, vector<64x32xbf16>, vector<8x32xf32> -> vector<8x32xf32>
    %c0_66 = arith.constant 0 : index
    %c0_67 = arith.constant 0 : index
    %c0_68 = arith.constant 0 : index
    %152 = vector.load %arg12[%c0_66, %c0_67, %c0_68] : memref<1x1x32xf32, #tpu.memory_space<vmem>>, vector<1x1x32xf32>
    %153 = vector.shape_cast %152 : vector<1x1x32xf32> to vector<1x32xf32>
    %154 = vector.broadcast %153 : vector<1x32xf32> to vector<8x32xf32>
    %155 = arith.addf %151, %154 : vector<8x32xf32>
    %156 = arith.addf %137, %155 : vector<8x32xf32>
    %c0_69 = arith.constant 0 : index
    %c0_70 = arith.constant 0 : index
    %c0_71 = arith.constant 0 : index
    %157 = vector.load %arg13[%c0_69, %c0_70, %c0_71] : memref<1x1x32xf32, #tpu.memory_space<vmem>>, vector<1x1x32xf32>
    %158 = vector.shape_cast %157 : vector<1x1x32xf32> to vector<1x32xf32>
    %c0_72 = arith.constant 0 : index
    %c0_73 = arith.constant 0 : index
    %c0_74 = arith.constant 0 : index
    %159 = vector.load %arg14[%c0_72, %c0_73, %c0_74] : memref<1x1x32xf32, #tpu.memory_space<vmem>>, vector<1x1x32xf32>
    %160 = vector.shape_cast %159 : vector<1x1x32xf32> to vector<1x32xf32>
    %cst_75 = arith.constant dense<0.000000e+00> : vector<8xf32>
    %161 = vector.multi_reduction <add>, %156, %cst_75 [1] : vector<8x32xf32> to vector<8xf32>
    %162 = vector.shape_cast %161 : vector<8xf32> to vector<8x1xf32>
    %cst_76 = arith.constant 3.200000e+01 : f32
    %163 = vector.broadcast %cst_76 : f32 to vector<8x1xf32>
    %164 = arith.divf %162, %163 : vector<8x1xf32>
    %165 = vector.broadcast %164 : vector<8x1xf32> to vector<8x32xf32>
    %166 = arith.subf %156, %165 : vector<8x32xf32>
    %167 = arith.mulf %166, %166 : vector<8x32xf32>
    %cst_77 = arith.constant dense<0.000000e+00> : vector<8xf32>
    %168 = vector.multi_reduction <add>, %167, %cst_77 [1] : vector<8x32xf32> to vector<8xf32>
    %169 = vector.shape_cast %168 : vector<8xf32> to vector<8x1xf32>
    %cst_78 = arith.constant 3.200000e+01 : f32
    %170 = vector.broadcast %cst_78 : f32 to vector<8x1xf32>
    %171 = arith.divf %169, %170 : vector<8x1xf32>
    %172 = vector.broadcast %164 : vector<8x1xf32> to vector<8x32xf32>
    %173 = arith.subf %156, %172 : vector<8x32xf32>
    %cst_79 = arith.constant 9.99999974E-6 : f32
    %174 = vector.broadcast %cst_79 : f32 to vector<8x1xf32>
    %175 = arith.addf %171, %174 : vector<8x1xf32>
    %176 = math.rsqrt %175 : vector<8x1xf32>
    %177 = vector.broadcast %176 : vector<8x1xf32> to vector<8x32xf32>
    %178 = arith.mulf %173, %177 : vector<8x32xf32>
    %179 = vector.broadcast %158 : vector<1x32xf32> to vector<8x32xf32>
    %180 = arith.mulf %178, %179 : vector<8x32xf32>
    %181 = vector.broadcast %160 : vector<1x32xf32> to vector<8x32xf32>
    %182 = arith.addf %180, %181 : vector<8x32xf32>
    %c0_80 = arith.constant 0 : index
    %c0_81 = arith.constant 0 : index
    %183 = vector.load %arg16[%c0_80, %c0_81] : memref<8x32xf32, #tpu.memory_space<vmem>>, vector<8x32xf32>
    tpu.vector_store %arg16[%c0_80, %c0_81], %182 {strides = array<i32>} : memref<8x32xf32, #tpu.memory_space<vmem>>, vector<8x32xf32>,
    %c1_i32 = arith.constant 1 : i32
    %184 = arith.cmpi eq, %arg1, %c1_i32 : i32
    %185 = arith.extui %184 : i1 to i32
    %c0_i32_82 = arith.constant 0 : i32
    %186 = arith.cmpi ne, %185, %c0_i32_82 : i32
    scf.if %186 {
      %c0_83 = arith.constant 0 : index
      %c0_84 = arith.constant 0 : index
      %c0_85 = arith.constant 0 : index
      %187 = vector.load %arg15[%c0_83, %c0_84, %c0_85] : memref<1x8x32xf32, #tpu.memory_space<vmem>>, vector<1x8x32xf32>
      %188 = vector.shape_cast %187 : vector<1x8x32xf32> to vector<8x32xf32>
      %189 = vector.shape_cast %182 : vector<8x32xf32> to vector<1x8x32xf32>
      tpu.vector_store %arg15[%c0_83, %c0_84, %c0_85], %189 {strides = array<i32>} : memref<1x8x32xf32, #tpu.memory_space<vmem>>, vector<1x8x32xf32>,
    } else {
    }
    return
  }
  func.func @transform_0(%arg0: i32, %arg1: i32) -> (i32, i32, i32) {
    %c0_i32 = arith.constant 0 : i32
    %c0_i32_0 = arith.constant 0 : i32
    %c0_i32_1 = arith.constant 0 : i32
    return %arg0, %c0_i32, %c0_i32_0 : i32, i32, i32
  }
  func.func @transform_1(%arg0: i32, %arg1: i32) -> (i32, i32, i32) {
    %c0_i32 = arith.constant 0 : i32
    %c0_i32_0 = arith.constant 0 : i32
    %c0_i32_1 = arith.constant 0 : i32
    return %arg1, %c0_i32, %c0_i32_0 : i32, i32, i32
  }
  func.func @transform_2(%arg0: i32, %arg1: i32) -> (i32, i32, i32) {
    %c0_i32 = arith.constant 0 : i32
    %c0_i32_0 = arith.constant 0 : i32
    %c0_i32_1 = arith.constant 0 : i32
    return %arg1, %c0_i32, %c0_i32_0 : i32, i32, i32
  }
  func.func @transform_3(%arg0: i32, %arg1: i32) -> (i32, i32, i32) {
    %c0_i32 = arith.constant 0 : i32
    %c0_i32_0 = arith.constant 0 : i32
    %c0_i32_1 = arith.constant 0 : i32
    return %arg1, %c0_i32, %c0_i32_0 : i32, i32, i32
  }
  func.func @transform_4(%arg0: i32, %arg1: i32) -> (i32, i32, i32) {
    %c0_i32 = arith.constant 0 : i32
    %c0_i32_0 = arith.constant 0 : i32
    %c0_i32_1 = arith.constant 0 : i32
    return %arg1, %c0_i32, %c0_i32_0 : i32, i32, i32
  }
  func.func @transform_5(%arg0: i32, %arg1: i32) -> (i32, i32, i32) {
    %c0_i32 = arith.constant 0 : i32
    %c0_i32_0 = arith.constant 0 : i32
    %c0_i32_1 = arith.constant 0 : i32
    return %arg1, %c0_i32, %c0_i32_0 : i32, i32, i32
  }
  func.func @transform_6(%arg0: i32, %arg1: i32) -> (i32, i32, i32) {
    %c0_i32 = arith.constant 0 : i32
    %c0_i32_0 = arith.constant 0 : i32
    %c0_i32_1 = arith.constant 0 : i32
    return %arg1, %c0_i32, %c0_i32_0 : i32, i32, i32
  }
  func.func @transform_7(%arg0: i32, %arg1: i32) -> (i32, i32, i32) {
    %c0_i32 = arith.constant 0 : i32
    %c0_i32_0 = arith.constant 0 : i32
    %c0_i32_1 = arith.constant 0 : i32
    return %arg1, %c0_i32, %c0_i32_0 : i32, i32, i32
  }
  func.func @transform_8(%arg0: i32, %arg1: i32) -> (i32, i32, i32) {
    %c0_i32 = arith.constant 0 : i32
    %c0_i32_0 = arith.constant 0 : i32
    %c0_i32_1 = arith.constant 0 : i32
    return %arg1, %c0_i32, %c0_i32_0 : i32, i32, i32
  }
  func.func @transform_9(%arg0: i32, %arg1: i32) -> (i32, i32, i32) {
    %c0_i32 = arith.constant 0 : i32
    %c0_i32_0 = arith.constant 0 : i32
    %c0_i32_1 = arith.constant 0 : i32
    return %arg1, %c0_i32, %c0_i32_0 : i32, i32, i32
  }
  func.func @transform_10(%arg0: i32, %arg1: i32) -> (i32, i32, i32) {
    %c0_i32 = arith.constant 0 : i32
    %c0_i32_0 = arith.constant 0 : i32
    %c0_i32_1 = arith.constant 0 : i32
    return %arg1, %c0_i32, %c0_i32_0 : i32, i32, i32
  }
  func.func @transform_11(%arg0: i32, %arg1: i32) -> (i32, i32, i32) {
    %c0_i32 = arith.constant 0 : i32
    %c0_i32_0 = arith.constant 0 : i32
    %c0_i32_1 = arith.constant 0 : i32
    return %arg1, %c0_i32, %c0_i32_0 : i32, i32, i32
  }
  func.func @transform_12(%arg0: i32, %arg1: i32) -> (i32, i32, i32) {
    %c0_i32 = arith.constant 0 : i32
    %c0_i32_0 = arith.constant 0 : i32
    %c0_i32_1 = arith.constant 0 : i32
    return %arg1, %c0_i32, %c0_i32_0 : i32, i32, i32
  }
  func.func @transform_13(%arg0: i32, %arg1: i32) -> (i32, i32, i32) {
    %c0_i32 = arith.constant 0 : i32
    %c0_i32_0 = arith.constant 0 : i32
    %c0_i32_1 = arith.constant 0 : i32
    return %arg0, %c0_i32, %c0_i32_0 : i32, i32, i32
  }
}

</mosaic_0001>

<bundles_post_ra>
// kernel: transformer_decoder_pallas.1
= control target key start
LH: loop header
LB: loop body
LE: loop exit
PB: predicated region body
PF: predicated region fallthrough
CT: control target
= control target key end

     0   :  { %s2488_s0 = inlined_call_operand.vmem [shape: f32[2,8,32], index: 0, kind: input, shape index: {}]   ;;  %s2489_s1 = inlined_call_operand.vmem [shape: bf16[2,32,96], index: 1, kind: input, shape index: {}]   ;;  %s2490_s2 = inlined_call_operand.vmem [shape: f32[2,1,96], index: 2, kind: input, shape index: {}]   ;;  %s2491_s3 = inlined_call_operand.vmem [shape: bf16[2,32,32], index: 3, kind: input, shape index: {}]   ;;  %s2492_s4 = inlined_call_operand.vmem [shape: f32[2,1,32], index: 4, kind: input, shape index: {}]   ;;  %s2493_s5 = inlined_call_operand.vmem [shape: f32[2,1,32], index: 5, kind: input, shape index: {}]   ;;  %s2494_s6 = inlined_call_operand.vmem [shape: f32[2,1,32], index: 6, kind: input, shape index: {}]   ;;  %s2495_s7 = inlined_call_operand.vmem [shape: bf16[2,32,64], index: 7, kind: input, shape index: {}]   ;;  %s2496_s8 = inlined_call_operand.vmem [shape: f32[2,1,64], index: 8, kind: input, shape index: {}]   ;;  %s2497_s9 = inlined_call_operand.vmem [shape: bf16[2,64,32], index: 9, kind: input, shape index: {}]   ;;  %s2498_s10 = inlined_call_operand.vmem [shape: f32[2,1,32], index: 10, kind: input, shape index: {}]   ;;  %s2499_s11 = inlined_call_operand.vmem [shape: f32[2,1,32], index: 11, kind: input, shape index: {}]   ;;  %s2500_s12 = inlined_call_operand.vmem [shape: f32[2,1,32], index: 12, kind: input, shape index: {}]   ;;  %s2501_s13 = inlined_call_operand.hbm [shape: f32[2,8,32], index: 13, kind: output, shape index: {}]  }
   0x1   :  { %2517 = sst [smem:[#allocation20_spill]] %s2488_s0 }
   0x2   :  { %2518 = sst [smem:[#allocation21_spill]] %s2489_s1 }
   0x3   :  { %2519 = sst [smem:[#allocation22_spill]] %s2491_s3 }
   0x4   :  { %2520 = sst [smem:[#allocation23_spill]] %s2495_s7 }
   0x5   :  { %2521 = sst [smem:[#allocation24_spill]] %s2500_s12 }
   0x6   :  { %2522 = sst [smem:[#allocation25_spill]] %s2501_s13 }
   0x7   :  { %18 = vsyncpa [#allocation5], 0 }
   0x8   :  { %20 = vsyncpa [#allocation5 + $0x1], 0  ;;  %s2150_s25 = smov 0   ;;  %s2152_s26 = smov 0  }
   0x9   :  { %s2154_s27 = smov 0   ;;  %s2156_s28 = smov 0  }
   0xa   :  { %s2158_s29 = smov 0   ;;  %s2160_s30 = smov 0  }
   0xb   :  { %s2162_s14 = smov 0   ;;  %s2164_s15 = smov 0  }
   0xc LB: > { %2523 = sst [smem:[#allocation7_spill]] %s2033_s25  ;;  %s1681_s16 = sadd.s32 4294967295, %s2061_s15   ;;  %s2061_s15 = sphi %s2164_s15, %s26_s15   ;;  %s2057_s14 = sphi %s2162_s14, %s2564_s14   ;;  %s2053_s30 = sphi %s2160_s30, %s2563_s30   ;;  %s2049_s29 = sphi %s2158_s29, %s2562_s29   ;;  %s2045_s28 = sphi %s2156_s28, %s2561_s28   ;;  %s2041_s27 = sphi %s2154_s27, %s2560_s27   ;;  %s2037_s26 = sphi %s2152_s26, %s2559_s26   ;;  %s2033_s25 = sphi %s2150_s25, %s2558_s25  }
   0xd   : > { %2524 = sst [smem:[#allocation8_spill]] %s2037_s26  ;;  %s1682_s17 = sadd.s32 4294967294, %s2061_s15  }
   0xe   : > { %2525 = sst [smem:[#allocation9_spill]] %s2041_s27  ;;  %s35_s18 = sadd.s32 1, %s2053_s30 }
   0xf   : > { %2526 = sst [smem:[#allocation10_spill]] %s2045_s28  ;;  %p36_p0 = scmp.ge.s32.totalorder %s35_s18, 2 }
  0x10   : > { %2527 = sst [smem:[#allocation11_spill]] %s2049_s29  ;;  %s38_s19 = sadd.s32 1, %s2057_s14 }
  0x11   : > { %2528 = sst [smem:[#allocation12_spill]] %s2053_s30  ;;  %p393_p1 = scmp.ne.s32.totalorder %s2041_s27, %s2037_s26 }
  0x12   : > { %2529 = sst [smem:[#allocation13_spill]] %s2057_s14  ;;  %p394_p2 = scmp.eq.s32.totalorder %s1681_s16, 3 }
  0x13   : > { %2530 = sst [smem:[#allocation14_spill]] %s2061_s15  ;;  %s2566_s18 = smov (%p36_p0, %s35_s18), 0 }
  0x14   : > { %2531 = sst [smem:[#allocation15_spill]] %s2566_s18  ;;  %s2568_s19 = smov (!%p36_p0, %s38_s19), %s2057_s14 }
  0x15   : > { %p2199_p3 = por %p394_p2, %p393_p1  ;;  %p399_p4 = scmp.ne.s32.totalorder %s2037_s26, %s2033_s25 }
  0x16   : > { %p40_p5 = scmp.ge.s32.totalorder %s2568_s19, 2  ;;  %p400_p6 = scmp.eq.s32.totalorder %s1682_s17, 3 }
  0x17   : > { %s2532_s20 = scalar_select %p2199_p3, 1, 0 }
  0x18   : > { %p1685_p7 = scmp.ge.s32.totalorder %s2061_s15, 1  ;;  %p505_p8 = scmp.lt.s32.totalorder %s2061_s15, 5 }
  0x19   : > { %2533 = sst [smem:[#allocation16_spill]] %s2532_s20  ;;  %s2570_s19 = smov (%p40_p5, %s2568_s19), 0 }
  0x1a   : > { %2534 = sst [smem:[#allocation17_spill]] %s2570_s19  ;;  %p2209_p9 = por %p400_p6, %p399_p4 }
  0x1b   : > { %p506_p10 = pnand %p1685_p7, %p505_p8  ;;  %s380_s22 = ssub.s32 %s2057_s14, %s2570_s19 }
  0x1c   : > { %s2535_s21 = scalar_select %p2209_p9, 1, 0 }
  0x1d   : > { %s383_s23 = sadd.s32 1, %s2041_s27  ;;  %p381_p11 = scmp.eq.s32.totalorder %s380_s22, 0 }
  0x1e   : > { %2536 = sst [smem:[#allocation18_spill]] %s2535_s21  ;;  %509 = sbr.rel (%p506_p10) target bundleno = 2640 (0xa50), region = 72 }
  0x1f   : > { %s2217_s24 = scalar_select %p381_p11, %s2041_s27, %s383_s23  }
  0x20   : > { %s2504_s16 = sand.u32 (!%p506_p10), 1, %s2037_s26   ;;  %p592_p12 = scmp.lt.s32.totalorder (!%p506_p10), %s2049_s29, 1 }
  0x21   : > { %2537 = sst [smem:[#allocation19_spill]] %s2217_s24  ;;  %s2223_s17 = sshll.u32 (!%p506_p10), %s2504_s16, 3 }
  0x22   : > { %p596_p13 = scmp.lt.s32.totalorder (!%p506_p10), %s2045_s28, 1  ;;  %s2538_s0 = sld [smem:[#allocation20_spill]] (!%p506_p10) }
  0x23   : > { %s2539_s1 = sld [smem:[#allocation21_spill]] (!%p506_p10)  ;;  %s2540_s3 = sld [smem:[#allocation22_spill]] (!%p506_p10) }
  0x24   : > { %s2541_s7 = sld [smem:[#allocation23_spill]] (!%p506_p10)  ;;  %s2542_s24 = sld [smem:[#allocation24_spill]] (!%p506_p10) }
  0x25   : > { %s593_s18 = scalar_select %p592_p12, %s2049_s29, 1 }
  0x26   : > { %s2228_s30 = scalar_select %p596_p13, %s2045_s28, 1 }
  0x27   : > { %s1687_s22 = sshll.u32 %s593_s18, 3  ;;  %s591_s26 = scalar_lea.vmem [#allocation4], %s2223_s17 }
  0x28   : > { %s595_s16 = scalar_lea.vmem %s2538_s0, %s1687_s22  ;;  %s1732_s14 = sshll.u32 %s2228_s30, 4 }
  0x29   : > { %s600_s21 = scalar_lea.vmem %s2539_s1, %s1732_s14  ;;  %s2244_s29 = scalar_lea.vmem %s2540_s3, %s1732_s14 }
  0x2a   : > { %s2261_s15 = scalar_lea.vmem %s2541_s7, %s1732_s14  ;;  %s625_s13 = scalar_lea.vmem %s2496_s8, %s2228_s30 }
  0x2b   : > { %s1735_s3 = sshll.u32 %s2228_s30, 5  ;;  %s633_s19 = scalar_lea.vmem %s2498_s10, %s2228_s30 }
  0x2c   : > { %s2275_s0 = scalar_lea.vmem %s2497_s9, %s1735_s3  ;;  %s636_s1 = scalar_lea.vmem %s2499_s11, %s2228_s30 }
  0x2d   : > { %s639_s7 = scalar_lea.vmem %s2542_s24, %s2228_s30  ;;  %s2543_s20 = sld [smem:[#allocation10_spill]] }
  0x33   : > { %p1696_p0 = scmp.ne.s32.totalorder %s2543_s20, 0 }
  0x34   : > { %v645_v0 = vld [vmem:[%s595_s16] sm:$0xff] (!%p1696_p0)  ;;  %vm646_vm0 = vcmask (!%p1696_p0), 261120  }
  0x35   : > { %644 = sbr.rel (%p1696_p0) target bundleno = 60 (0x3c), region = 76  ;;  %647 = vst.msk [vmem:[#allocation2] sm:$0xff] (!%p1696_p0), %vm646_vm0, %v645_v0 }
  0x3c PF: > { %v1937_v1 = vld [vmem:[%s600_s21] sm:$0xff]   ;;  %v2063_v2 = vmov 0.0   ;;  %v1938_v3 = vld [vmem:[%s600_s21 + $0x8] sm:$0xff]   ;;  %vm2064_vm1 = vmmov 0   ;;  %vm673_vm2 = vcmask 261120   ;;  %s2544_s16 = scalar_lea.vmem %s2490_s2, %s2228_s30  ;;  %s2065_s24 = smov 96   ;;  %v720_v26 = vlaneseq }
  0x3d   : > { %1766 = vmatprep.subr.bf16.mxu0 %v2063_v2  ;;  %1774 = vmatprep.subr.bf16.mxu1 %v2063_v2  ;;  %v2291_v4 = vld [vmem:[#allocation2] sm:$0xff]  ;;  %s2066_s28 = smov 120   ;;  %s2067_s18 = smov 88   ;;  %vm727_vm3 = vcmask 64512   ;;  %vm793_vm5 = vcmask 1043456   ;;  %vm954_vm6 = vcmask 130112  }
  0x3e   : > { %1767 = vmatpush3.bf16.msra.mxu0 %v1937_v1  ;;  %1770 = vmatprep.mubr.msk.bf16.mxu0 %vm2064_vm1, %v2063_v2  ;;  %v649_v5 = vpack.c.bf16 %v2291_v4, %v2291_v4  ;;  %v1697_v6 = vld [vmem:[%s2544_s16] ss:$0 sm:$0xff]  ;;  %s2068_s23 = smov 80   ;;  %s2069_s22 = smov 112   ;;  %v721_v27 = vshrl.u32 %v720_v26, 7  ;;  %v723_v28 = vand.u32 127, %v720_v26 }
  0x3f   : > { %1768 = vmatprep.subr.bf16.mxu0 %v2063_v2  ;;  %1776 = vmatprep.mubr.msk.bf16.mxu1 %vm2064_vm1, %v2063_v2  ;;  %s2070_s12 = smov 72   ;;  %s2071_s27 = smov 104   ;;  %vm1071_vm7 = vcmask 195712   ;;  %vm1188_vm8 = vcmask 261312   ;;  %vm1397_vm9 = vcmask 523264  }
  0x40   : > { %vm774_vm4 = vcmp.gt.s32.totalorder %v723_v28, %v721_v27  ;;  %s2072_s14 = smov 56   ;;  %s2073_s25 = smov 64  }
  0x41   : > { %s2074_s20 = smov 40   ;;  %s2075_s3 = smov 48  }
  0x42   : > { %1769 = vmatpush3.bf16.msra.mxu0 %v1938_v3  ;;  %s2076_s21 = smov 8   ;;  %s2077_s16 = smov 16  }
  0x43   : > { %1780 = vmatprep.subr.bf16.mxu0 %v2063_v2 }
  0x45   : > { %1771 = vmatmul.mubr.msk.bf16.vlgmr.msra.gmra.mrb[0].mxu0 %vm673_vm2, %v649_v5 }
  0x46   : > { %1782 = vmatprep.mubr.msk.bf16.mxu0 %vm2064_vm1, %v2063_v2 }
 0x118   : > { %v711_v7 = vpop.f32.mrb[0].mxu0 }
 0x119   : > { %v712_v8 = vadd.f32 %v1697_v6, %v711_v7  ;;  %v1772_v9 = vpop.f32.mrb[1].mxu0 }
 0x11a   : > { %v714_v10 = vpop.f32.mrb[2].mxu0 }
 0x11b   : > { %v717_v11 = vmul.f32 0.35355338, %v712_v8  ;;  %v2307_v12 = vpack.c.bf16 %v712_v8, %v712_v8  ;;  %v1773_v13 = vpop.f32.mrb[3].mxu0 }
 0x11d   : > { %v718_v14 = vpack.c.bf16 %v717_v11, %v717_v11  ;;  %725 = vrot.lane.b32.xlu0 %v2307_v12, %s2065_s24  ;;  %s2078_s24 = smov 24  }
 0x11f   : > { %839 = vrot.lane.b32.xlu1 %v718_v14, %s2066_s28 }
 0x121   : > { %841 = vrot.lane.b32.xlu0 %v2307_v12, %s2067_s18  ;;  %s2545_s18 = scalar_lea.vmem %s2492_s4, %s2228_s30 }
 0x123   : > { %958 = vrot.lane.b32.xlu1 %v2307_v12, %s2068_s23 }
 0x125   : > { %956 = vrot.lane.b32.xlu0 %v718_v14, %s2069_s22 }
 0x127   : > { %1075 = vrot.lane.b32.xlu1 %v2307_v12, %s2070_s12 }
 0x129   : > { %1073 = vrot.lane.b32.xlu0 %v718_v14, %s2071_s27 }
 0x18f   : > { %v726_v15 = vpop.permute.xlu0 %725 }
 0x190   : > { %v732_v16 = vsel %vm727_vm3, %v726_v15, 0 }
 0x191   : > { %1775 = vmatpush3.bf16.xpose.msra.mxu1 %v732_v16  ;;  %v840_v18 = vpop.permute.xlu1 %839 }
 0x192   : > { %1786 = vmatprep.subr.bf16.mxu1 %v2063_v2 }
 0x193   : > { %v842_v17 = vpop.permute.xlu0 %841 }
 0x194   : > { %v847_v19 = vsel %vm727_vm3, %v842_v17, 0 }
 0x195   : > { %v959_v20 = vpop.permute.xlu1 %958 }
 0x196   : > { %v964_v21 = vsel %vm727_vm3, %v959_v20, 0 }
 0x197   : > { %v957_v23 = vpop.permute.xlu0 %956 }
 0x198   : > { %1777 = vmatmul.mubr.msk.bf16.vlgmr.msra.gmra.mrb[0].mxu1 %vm727_vm3, %v718_v14 }
 0x199   : > { %1787 = vmatpush3.bf16.xpose.msra.mxu1 %v847_v19  ;;  %1788 = vmatprep.mubr.msk.bf16.mxu1 %vm2064_vm1, %v2063_v2  ;;  %v1076_v22 = vpop.permute.xlu1 %1075 }
 0x19a   : > { %1798 = vmatprep.subr.bf16.mxu1 %v2063_v2  ;;  %v1081_v24 = vsel %vm727_vm3, %v1076_v22, 0 }
 0x19b   : > { %v1074_v25 = vpop.permute.xlu0 %1073 }
 0x1a0   : > { %1789 = vmatmul.mubr.msk.bf16.vlgmr.msra.gmra.mrb[4].mxu1 %vm727_vm3, %v840_v18 }
 0x1a1   : > { %1799 = vmatpush3.bf16.xpose.msra.mxu1 %v964_v21  ;;  %1800 = vmatprep.mubr.msk.bf16.mxu1 %vm2064_vm1, %v2063_v2 }
 0x1a2   : > { %1810 = vmatprep.subr.bf16.mxu1 %v2063_v2 }
 0x1a8   : > { %1801 = vmatmul.mubr.msk.bf16.vlgmr.msra.gmra.mrb[8].mxu1 %vm727_vm3, %v957_v23 }
 0x1a9   : > { %1811 = vmatpush3.bf16.xpose.msra.mxu1 %v1081_v24  ;;  %1812 = vmatprep.mubr.msk.bf16.mxu1 %vm2064_vm1, %v2063_v2 }
 0x1aa   : > { %1822 = vmatprep.subr.bf16.mxu1 %v2063_v2 }
 0x1b0   : > { %1813 = vmatmul.mubr.msk.bf16.vlgmr.msra.gmra.mrb[12].mxu1 %vm727_vm3, %v1074_v25 }
 0x1b1   : > { %1826 = vmatprep.mubr.msk.bf16.mxu1 %vm2064_vm1, %v2063_v2 }
 0x26b   : > { %v768_v29 = vpop.f32.mrb[0].mxu1 }
 0x26c   : > { %v775_v30 = vsel %vm774_vm4, -1e+30, %v768_v29  ;;  %v1778_v31 = vpop.f32.mrb[1].mxu1 }
 0x26d   : > { %v771_v32 = vpop.f32.mrb[2].mxu1  ;;  %v776_v33 = vsel %vm727_vm3, %v775_v30, -inf }
 0x26e   : > { %777 = vmax.xlane.f32.xlu1 %v776_v33  ;;  %v1779_v34 = vpop.f32.mrb[3].mxu1 }
 0x273   : > { %v883_v35 = vpop.f32.mrb[4].mxu1 }
 0x274   : > { %v889_v36 = vsel %vm774_vm4, -1e+30, %v883_v35  ;;  %v1790_v37 = vpop.f32.mrb[5].mxu1 }
 0x275   : > { %v886_v38 = vpop.f32.mrb[6].mxu1  ;;  %v890_v39 = vsel %vm727_vm3, %v889_v36, -inf }
 0x276   : > { %891 = vmax.xlane.f32.xlu0 %v890_v39  ;;  %v1791_v40 = vpop.f32.mrb[7].mxu1 }
 0x27b   : > { %v1000_v41 = vpop.f32.mrb[8].mxu1 }
 0x27c   : > { %v1006_v42 = vsel %vm774_vm4, -1e+30, %v1000_v41  ;;  %v1802_v43 = vpop.f32.mrb[9].mxu1 }
 0x27d   : > { %v1003_v44 = vpop.f32.mrb[10].mxu1  ;;  %v1007_v45 = vsel %vm727_vm3, %v1006_v42, -inf  ;;  %v1939_v43 = vld [vmem:[%s2244_s29] sm:$0xff]  }
 0x27e   : > { %1008 = vmax.xlane.f32.xlu0 %v1007_v45  ;;  %v1803_v46 = vpop.f32.mrb[11].mxu1  ;;  %1823 = vmatpush3.bf16.msra.mxu1 %v1939_v43  ;;  %v1940_v44 = vld [vmem:[%s2244_s29 + $0x8] sm:$0xff]   ;;  %s2549_s29 = sld [smem:[#allocation10_spill]] }
 0x27f   : > { %1824 = vmatprep.subr.bf16.mxu1 %v2063_v2 }
 0x282   : > { %1825 = vmatpush3.bf16.msra.mxu1 %v1940_v44 }
 0x283   : > { %v1117_v47 = vpop.f32.mrb[12].mxu1  ;;  %1838 = vmatprep.subr.bf16.mxu1 %v2063_v2 }
 0x284   : > { %v1123_v48 = vsel %vm774_vm4, -1e+30, %v1117_v47  ;;  %v1814_v49 = vpop.f32.mrb[13].mxu1  ;;  %p1727_p1 = scmp.ne.s32.totalorder %s2549_s29, 1 }
 0x285   : > { %v1120_v50 = vpop.f32.mrb[14].mxu1  ;;  %v1124_v51 = vsel %vm727_vm3, %v1123_v48, -inf }
 0x286   : > { %1125 = vmax.xlane.f32.xlu1 %v1124_v51  ;;  %v1815_v52 = vpop.f32.mrb[15].mxu1 }
 0x2fb   : > { %v778_v53 = vpop.xlane.xlu1 %777 }
 0x2fc   : > { %v779_v54 = vsub.f32 %v775_v30, %v778_v53 }
 0x2fe   : > { %v780_v55 = vmul.f32 1.442695, %v779_v54 }
 0x300   : > { %1947 = vpow2.f32 %v780_v55 }
 0x303   : > { %v892_v56 = vpop.xlane.xlu0 %891 }
 0x304   : > { %v893_v57 = vsub.f32 %v889_v36, %v892_v56 }
 0x306   : > { %v894_v58 = vmul.f32 1.442695, %v893_v57 }
 0x308   : > { %1949 = vpow2.f32 %v894_v58  ;;  %v1709_v58 = vld [vmem:[%s2545_s18] ss:$0 sm:$0xff] }
 0x30a   : > { %v1948_v59 = vpop.eup %1947 }
 0x30b   : > { %v1009_v60 = vpop.xlane.xlu0 %1008  ;;  %v782_v61 = vsel %vm727_vm3, %v1948_v59, 0.0 }
 0x30c   : > { %v1010_v62 = vsub.f32 %v1006_v42, %v1009_v60  ;;  %783 = vadd.xlane.f32.xlu0 %v782_v61 }
 0x30e   : > { %v1011_v63 = vmul.f32 1.442695, %v1010_v62 }
 0x310   : > { %1951 = vpow2.f32 %v1011_v63 }
 0x312   : > { %v1950_v0 = vpop.eup %1949 }
 0x313   : > { %v896_v1 = vsel %vm727_vm3, %v1950_v0, 0.0  ;;  %v1126_v6 = vpop.xlane.xlu1 %1125 }
 0x314   : > { %897 = vadd.xlane.f32.xlu1 %v896_v1  ;;  %v1127_v7 = vsub.f32 %v1123_v48, %v1126_v6 }
 0x316   : > { %v1128_v8 = vmul.f32 1.442695, %v1127_v7 }
 0x318   : > { %1953 = vpow2.f32 %v1128_v8 }
 0x31a   : > { %v1952_v3 = vpop.eup %1951 }
 0x31b   : > { %v1013_v5 = vsel %vm727_vm3, %v1952_v3, 0.0 }
 0x31c   : > { %1014 = vadd.xlane.f32.xlu0 %v1013_v5 }
 0x322   : > { %v1954_v9 = vpop.eup %1953 }
 0x323   : > { %v1130_v10 = vsel %vm727_vm3, %v1954_v9, 0.0 }
 0x325   : > { %902 = vrot.lane.b32.xlu1 %v2307_v12, %s2072_s14  ;;  %s2547_s14 = scalar_lea.vmem %s2494_s6, %s2228_s30 }
 0x332   : > { %788 = vrot.lane.b32.xlu0 %v2307_v12, %s2073_s25 }
 0x336   : > { %1136 = vrot.lane.b32.xlu0 %v2307_v12, %s2074_s20 }
 0x349   : > { %1131 = vadd.xlane.f32.xlu1 %v1130_v10  ;;  %v1942_v10 = vld [vmem:[%s2261_s15 + $0x8] sm:$0xff]  }
 0x35a   : > { %1019 = vrot.lane.b32.xlu1 %v2307_v12, %s2075_s3 }
 0x399   : > { %v784_v11 = vpop.xlane.xlu0 %783 }
 0x39a   : > { %1955 = vrcp.f32 %v784_v11  ;;  %v1944_v11 = vld [vmem:[%s2275_s0 + $0x8] sm:$0xff]  }
 0x3a1   : > { %v898_v13 = vpop.xlane.xlu1 %897 }
 0x3a2   : > { %1957 = vrcp.f32 %v898_v13 }
 0x3a4   : > { %v1956_v14 = vpop.eup %1955 }
 0x3a5   : > { %v786_v16 = vmul.f32 %v1956_v14, %v1948_v59  ;;  %v903_v19 = vpop.permute.xlu1 %902 }
 0x3a6   : > { %v908_v22 = vsel %vm793_vm5, %v903_v19, 0  ;;  %v1714_v19 = vld [vmem:[%s2547_s14] ss:$0 sm:$0xff] }
 0x3a7   : > { %v787_v20 = vpack.c.bf16 %v786_v16, %v786_v16 }
 0x3a9   : > { %v1015_v15 = vpop.xlane.xlu0 %1014 }
 0x3aa   : > { %1959 = vrcp.f32 %v1015_v15 }
 0x3ac   : > { %v1958_v21 = vpop.eup %1957 }
 0x3ad   : > { %v789_v17 = vpop.permute.xlu0 %788  ;;  %v900_v12 = vmul.f32 %v1958_v21, %v1950_v0 }
 0x3ae   : > { %v795_v18 = vsel %vm793_vm5, %v789_v17, 0 }
 0x3af   : > { %1781 = vmatpush3.bf16.msra.mxu0 %v795_v18  ;;  %v901_v23 = vpack.c.bf16 %v900_v12, %v900_v12  ;;  %v1945_v12 = vld [vmem:[%s2275_s0 + $0x10] sm:$0xff]  }
 0x3b0   : > { %1792 = vmatprep.subr.bf16.mxu0 %v2063_v2 }
 0x3b1   : > { %v1137_v29 = vpop.permute.xlu0 %1136 }
 0x3b2   : > { %1783 = vmatmul.mubr.msk.bf16.vlgmr.msra.gmra.mrb[4].mxu0 %vm727_vm3, %v787_v20  ;;  %v1142_v31 = vsel %vm793_vm5, %v1137_v29, 0 }
 0x3b3   : > { %1793 = vmatpush3.bf16.msra.mxu0 %v908_v22  ;;  %1794 = vmatprep.mubr.msk.bf16.mxu0 %vm2064_vm1, %v2063_v2 }
 0x3b4   : > { %1804 = vmatprep.subr.bf16.mxu0 %v2063_v2  ;;  %v1960_v24 = vpop.eup %1959 }
 0x3b5   : > { %v1017_v26 = vmul.f32 %v1960_v24, %v1952_v3  ;;  %v1715_v24 = vld [vmem:[%s625_s13] ss:$0 sm:$0xff] }
 0x3b7   : > { %v1018_v30 = vpack.c.bf16 %v1017_v26, %v1017_v26 }
 0x3ba   : > { %1795 = vmatmul.mubr.msk.bf16.vlgmr.msra.gmra.mrb[8].mxu0 %vm727_vm3, %v901_v23  ;;  %v1946_v23 = vld [vmem:[%s2275_s0 + $0x18] sm:$0xff]  }
 0x3bb   : > { %1806 = vmatprep.mubr.msk.bf16.mxu0 %vm2064_vm1, %v2063_v2 }
 0x3d6   : > { %v1132_v25 = vpop.xlane.xlu1 %1131 }
 0x3d7   : > { %1961 = vrcp.f32 %v1132_v25 }
 0x3da   : > { %v1020_v27 = vpop.permute.xlu1 %1019 }
 0x3db   : > { %v1025_v28 = vsel %vm793_vm5, %v1020_v27, 0 }
 0x3dc   : > { %1805 = vmatpush3.bf16.msra.mxu0 %v1025_v28 }
 0x3dd   : > { %1816 = vmatprep.subr.bf16.mxu0 %v2063_v2 }
 0x3df   : > { %1807 = vmatmul.mubr.msk.bf16.vlgmr.msra.gmra.mrb[12].mxu0 %vm727_vm3, %v1018_v30 }
 0x3e0   : > { %1817 = vmatpush3.bf16.msra.mxu0 %v1142_v31  ;;  %1818 = vmatprep.mubr.msk.bf16.mxu0 %vm2064_vm1, %v2063_v2 }
 0x3e1   : > { %v1962_v32 = vpop.eup %1961  ;;  %1830 = vmatprep.subr.bf16.mxu0 %v2063_v2 }
 0x3e2   : > { %v1134_v33 = vmul.f32 %v1962_v32, %v1954_v9  ;;  %v1941_v9 = vld [vmem:[%s2261_s15] sm:$0xff]   ;;  %s2546_s15 = scalar_lea.vmem %s2493_s5, %s2228_s30 }
 0x3e3   : > { %v1713_v17 = vld [vmem:[%s2546_s15] ss:$0 sm:$0xff] }
 0x3e4   : > { %v1135_v34 = vpack.c.bf16 %v1134_v33, %v1134_v33 }
 0x3e7   : > { %1819 = vmatmul.mubr.msk.bf16.vlgmr.msra.gmra.mrb[16].mxu0 %vm727_vm3, %v1135_v34 }
 0x3e8   : > { %1834 = vmatprep.mubr.msk.bf16.mxu0 %vm2064_vm1, %v2063_v2  ;;  %1831 = vmatpush3.bf16.msra.mxu0 %v1941_v9 }
 0x3e9   : > { %1832 = vmatprep.subr.bf16.mxu0 %v2063_v2 }
 0x3ec   : > { %1833 = vmatpush3.bf16.msra.mxu0 %v1942_v10 }
 0x485   : > { %v831_v35 = vpop.f32.mrb[4].mxu0 }
 0x486   : > { %837 = vst.msk [vmem:[#allocation3] sm:$0xff] %vm727_vm3, %v831_v35  ;;  %v1784_v36 = vpop.f32.mrb[5].mxu0 }
 0x487   : > { %v834_v37 = vpop.f32.mrb[6].mxu0 }
 0x488   : > { %v1785_v38 = vpop.f32.mrb[7].mxu0 }
 0x48d   : > { %v944_v39 = vpop.f32.mrb[8].mxu0 }
 0x48e   : > { %951 = vrot.lane.b32.xlu1 %v944_v39, %s2076_s21  ;;  %v1796_v40 = vpop.f32.mrb[9].mxu0 }
 0x48f   : > { %v947_v41 = vpop.f32.mrb[10].mxu0 }
 0x490   : > { %v1797_v42 = vpop.f32.mrb[11].mxu0 }
 0x4b2   : > { %v1061_v45 = vpop.f32.mrb[12].mxu0 }
 0x4b3   : > { %1068 = vrot.lane.b32.xlu0 %v1061_v45, %s2077_s16  ;;  %v1808_v46 = vpop.f32.mrb[13].mxu0 }
 0x4b4   : > { %v1064_v47 = vpop.f32.mrb[14].mxu0 }
 0x4b5   : > { %v1809_v48 = vpop.f32.mrb[15].mxu0 }
 0x4b6   : > { %v1725_v48 = vld [vmem:[%s636_s1] ss:$0 sm:$0xff] }
 0x4ba   : > { %v1178_v49 = vpop.f32.mrb[16].mxu0 }
 0x4bb   : > { %1185 = vrot.lane.b32.xlu1 %v1178_v49, %s2078_s24  ;;  %v1820_v50 = vpop.f32.mrb[17].mxu0 }
 0x4bc   : > { %v1181_v51 = vpop.f32.mrb[18].mxu0  ;;  %v1726_v50 = vld [vmem:[%s639_s7] ss:$0 sm:$0xff] }
 0x4bd   : > { %v1821_v52 = vpop.f32.mrb[19].mxu0 }
 0x500   : > { %v952_v53 = vpop.permute.xlu1 %951 }
 0x501   : > { %955 = vst.msk [vmem:[#allocation3] sm:$0xff] %vm954_vm6, %v952_v53 }
 0x525   : > { %v1069_v54 = vpop.permute.xlu0 %1068 }
 0x526   : > { %1072 = vst.msk [vmem:[#allocation3] sm:$0xff] %vm1071_vm7, %v1069_v54 }
 0x52d   : > { %v1186_v55 = vpop.permute.xlu1 %1185 }
 0x52e   : > { %1189 = vst.msk [vmem:[#allocation3] sm:$0xff] %vm1188_vm8, %v1186_v55 }
 0x535   : > { %v1190_v56 = vld [vmem:[#allocation3] sm:$0xff] }
 0x536   : > { %v1191_v57 = vpack.c.bf16 %v1190_v56, %v1190_v56 }
 0x538   : > { %1827 = vmatmul.mubr.msk.bf16.vlgmr.msra.gmra.mrb[16].mxu1 %vm673_vm2, %v1191_v57 }
 0x539   : > { %1846 = vmatprep.mubr.msk.bf16.mxu1 %vm2064_vm1, %v2063_v2 }
 0x60b   : > { %v1252_v59 = vpop.f32.mrb[16].mxu1 }
 0x60c   : > { %v1253_v60 = vadd.f32 %v1709_v58, %v1252_v59  ;;  %v1828_v61 = vpop.f32.mrb[17].mxu1 }
 0x60d   : > { %v1255_v62 = vpop.f32.mrb[18].mxu1 }
 0x60e   : > { %v1829_v63 = vpop.f32.mrb[19].mxu1  ;;  %v1258_v0 = vadd.f32 %v1253_v60, %v2291_v4  ;;  %v1943_v4 = vld [vmem:[%s2275_s0] sm:$0xff]  }
 0x60f   : > { %1839 = vmatpush3.bf16.msra.mxu1 %v1943_v4 }
 0x610   : > { %v1261_v1 = vsel %vm673_vm2, %v1258_v0, 0.0  ;;  %1840 = vmatprep.subr.bf16.mxu1 %v2063_v2 }
 0x611   : > { %1262 = vadd.xlane.f32.xlu0 %v1261_v1 }
 0x613   : > { %1841 = vmatpush3.bf16.msra.mxu1 %v1944_v11 }
 0x614   : > { %1842 = vmatprep.subr.bf16.mxu1 %v2063_v2 }
 0x617   : > { %1843 = vmatpush3.bf16.msra.mxu1 %v1945_v12 }
 0x618   : > { %1844 = vmatprep.subr.bf16.mxu1 %v2063_v2  ;;  %v1719_v2 = vld [vmem:[%s633_s19] ss:$0 sm:$0xff] }
 0x61b   : > { %1845 = vmatpush3.bf16.msra.mxu1 %v1946_v23 }
 0x69e   : > { %v1263_v3 = vpop.xlane.xlu0 %1262 }
 0x69f   : > { %v1265_v5 = vmul.f32 0.03125, %v1263_v3 }
 0x6a1   : > { %v1266_v6 = vsub.f32 %v1258_v0, %v1265_v5 }
 0x6a3   : > { %v1267_v7 = vmul.f32 %v1266_v6, %v1266_v6 }
 0x6a5   : > { %v1268_v8 = vsel %vm673_vm2, %v1267_v7, 0.0 }
 0x6a6   : > { %1269 = vadd.xlane.f32.xlu1 %v1268_v8 }
 0x733   : > { %v1270_v13 = vpop.xlane.xlu1 %1269 }
 0x734   : > { %v1271_v14 = vmul.f32 0.03125, %v1270_v13 }
 0x736   : > { %v1272_v15 = vadd.f32 1e-05, %v1271_v14 }
 0x738   : > { %1963 = vrsqrt.f32 %v1272_v15 }
 0x742   : > { %v1964_v16 = vpop.eup %1963 }
 0x743   : > { %v1274_v18 = vmul.f32 %v1964_v16, %v1266_v6 }
 0x745   : > { %v1281_v20 = vmul.f32 %v1713_v17, %v1274_v18 }
 0x747   : > { %v1288_v21 = vadd.f32 %v1714_v19, %v1281_v20 }
 0x749   : > { %v1289_v22 = vpack.c.bf16 %v1288_v21, %v1288_v21 }
 0x74b   : > { %1835 = vmatmul.mubr.msk.bf16.vlgmr.msra.gmra.mrb[20].mxu0 %vm673_vm2, %v1289_v22 }
 0x81e   : > { %v1350_v25 = vpop.f32.mrb[20].mxu0 }
 0x81f   : > { %v1351_v26 = vadd.f32 %v1715_v24, %v1350_v25  ;;  %v1836_v27 = vpop.f32.mrb[21].mxu0 }
 0x820   : > { %v1353_v28 = vpop.f32.mrb[22].mxu0 }
 0x821   : > { %v1356_v29 = vmax.f32 %v1351_v26, 0.0  ;;  %v1837_v30 = vpop.f32.mrb[23].mxu0 }
 0x823   : > { %v1357_v31 = vpack.c.bf16 %v1356_v29, %v1356_v29 }
 0x825   : > { %1847 = vmatmul.mubr.msk.bf16.vlgmr.msra.gmra.mrb[20].mxu1 %vm1397_vm9, %v1357_v31 }
 0x8f8   : > { %v1435_v32 = vpop.f32.mrb[20].mxu1 }
 0x8f9   : > { %v1436_v33 = vadd.f32 %v1719_v2, %v1435_v32  ;;  %v1848_v34 = vpop.f32.mrb[21].mxu1 }
 0x8fa   : > { %v1438_v35 = vpop.f32.mrb[22].mxu1 }
 0x8fb   : > { %v1849_v36 = vpop.f32.mrb[23].mxu1  ;;  %v1441_v37 = vadd.f32 %v1436_v33, %v1288_v21 }
 0x8fd   : > { %v1444_v38 = vsel %vm673_vm2, %v1441_v37, 0.0 }
 0x8fe   : > { %1445 = vadd.xlane.f32.xlu0 %v1444_v38 }
 0x98b   : > { %v1446_v39 = vpop.xlane.xlu0 %1445 }
 0x98c   : > { %v1447_v40 = vmul.f32 0.03125, %v1446_v39 }
 0x98e   : > { %v1448_v41 = vsub.f32 %v1441_v37, %v1447_v40 }
 0x990   : > { %v1449_v42 = vmul.f32 %v1448_v41, %v1448_v41 }
 0x992   : > { %v1450_v43 = vsel %vm673_vm2, %v1449_v42, 0.0 }
 0x993   : > { %1451 = vadd.xlane.f32.xlu0 %v1450_v43 }
 0xa20   : > { %v1452_v44 = vpop.xlane.xlu0 %1451 }
 0xa21   : > { %v1453_v45 = vmul.f32 0.03125, %v1452_v44 }
 0xa23   : > { %v1454_v46 = vadd.f32 1e-05, %v1453_v45 }
 0xa25   : > { %1965 = vrsqrt.f32 %v1454_v46 }
 0xa2f   : > { %v1966_v47 = vpop.eup %1965 }
 0xa30   : > { %v1456_v49 = vmul.f32 %v1966_v47, %v1448_v41  ;;  %1475 = sbr.rel (%p1727_p1) target bundleno = 2615 (0xa37), region = 80 }
 0xa32   : > { %v1463_v51 = vmul.f32 %v1725_v48, %v1456_v49 }
 0xa34   : > { %v1470_v52 = vadd.f32 %v1726_v50, %v1463_v51 }
 0xa36   : > { %1471 = vst.msk [vmem:[#allocation2] sm:$0xff] %vm673_vm2, %v1470_v52  ;;  %1476 = vst.msk [vmem:[%s591_s26] sm:$0xff] (!%p1727_p1), %vm673_vm2, %v1470_v52 }
 0xa37 PF: > { %s2550_s28 = sld [smem:[#allocation11_spill]]  ;;  %s2551_s1 = sld [smem:[#allocation8_spill]] }
 0xa38   : > { %s2553_s7 = sld [smem:[#allocation25_spill]]  ;;  %s1491_s12 = sshll.u32 %s591_s26, 4  ;;  %s1492_s12 = int_to_ptr.vmem [resolvable:$true] %s1491_s12 }
 0xa39   : > { %s1967_s25 = scalar_lea.vmem %s1492_s12, 128  ;;  %s2079_s20 = smov [#allocation4]  }
 0xa3a   : > { %p1968_p2 = scmp.ne.s32.totalorder %s1492_s12, %s1967_s25  ;;  %s1971_s3 = sshll.u32 %s2079_s20, 4  ;;  %s1972_s3 = int_to_ptr.vmem [resolvable:$false] %s1971_s3 }
 0xa3b   : > { %s1973_s21 = scalar_lea.vmem %s1972_s3, 256  ;;  %p1974_p6 = scmp.lt.s32.totalorder %s1492_s12, %s1972_s3 }
 0xa3c   : > { %p1969_p4 = pnand %p1968_p2, %p2199_p3  ;;  %p1975_p7 = scmp.lt.s32.totalorder %s1973_s21, %s1967_s25 }
 0xa3d   : > { %s1729_s23 = sshll.u32 %s2550_s28, 7  ;;  %s2554_s27 = sand.u32 1, %s2551_s1  }
 0xa3e   : > { %s2437_s15 = scalar_lea.hbm %s2553_s7, %s1729_s23  ;;  %s1478_s14 = scalar_lea.sflag [#allocation5], %s2554_s27 }
 0xa3f   : > { %p1970_p5 = pneg %p1969_p4  ;;  %p1976_p8 = por %p1975_p7, %p1974_p6 }
 0xa41   : > { %p1977_p10 = pnand %p1976_p8, %p1970_p5 }
 0xa43   : > { %1980 = shalt.err (!%p1977_p10)
}
 0xa44   : > { %s1981_s17 = scalar_lea.hbm %s2437_s15, 128  ;;  %s1985_s13 = scalar_lea.hbm %s2553_s7, 256 }
 0xa45   : > { %p1982_p11 = scmp.ne.s32.totalorder %s2437_s15, %s1981_s17  ;;  %p1986_p0 = scmp.lt.u32.totalorder %s2437_s15, %s2553_s7 }
 0xa46   : > { %p1987_p1 = scmp.lt.u32.totalorder %s1985_s13, %s1981_s17  ;;  %p1989_p4 = scmp.lt.u32.totalorder %s1981_s17, %s2437_s15 }
 0xa47   : > { %p1983_p12 = pnand %p1982_p11, %p2199_p3 }
 0xa48   : > { %p1988_p2 = por %p1987_p1, %p1986_p0 }
 0xa49   : > { %p1984_p13 = pneg %p1983_p12 }
 0xa4a   : > { %p1990_p5 = por %p1989_p4, %p1988_p2 }
 0xa4c   : > { %p1991_p6 = pnand %p1990_p5, %p1984_p13 }
 0xa4e   : > { %1994 = shalt.err (!%p1991_p6)
}
 0xa4f   : > { %1850 = dma.vmem_to_hbm [thread:$0]  (%p2199_p3), %s1492_s12, 128, %s2437_s15, %s1478_s14  }
 0xa50 PF: > { %s2555_s24 = sld [smem:[#allocation14_spill]]  ;;  %s2556_s29 = sld [smem:[#allocation7_spill]] }
 0xa56   : > { %p1856_p7 = scmp.ge.s32.totalorder %s2555_s24, 2  ;;  %s1503_s1 = sand.u32 1, %s2556_s29  }
 0xa57   : > { %s1504_s23 = scalar_lea.sflag [#allocation5], %s1503_s1 }
 0xa58   : > { %p1853_p8 = pnand %p1856_p7, %p2209_p9 }
 0xa5a   : > { %2028 = dma.done.wait (!%p1853_p8), %s1504_s23, 128  }
 0xa5b   : > { %2030 = vsyncadd (!%p1853_p8), %s1504_s23, 4294967168  ;;  %s26_s15 = sadd.s32 1, %s2555_s24   ;;  %s2558_s25 = sld [smem:[#allocation8_spill]] }
 0xa5c   : > { %p23_p10 = scmp.ge.s32.totalorder %s26_s15, 6   ;;  %s2559_s26 = sld [smem:[#allocation9_spill]] }
 0xa5d   : > { %s2560_s27 = sld [smem:[#allocation19_spill]]  ;;  %s2561_s28 = sld [smem:[#allocation12_spill]] }
 0xa5e   : > { %s2562_s29 = sld [smem:[#allocation13_spill]]  ;;  %s2563_s30 = sld [smem:[#allocation15_spill]] }
 0xa5f   : > { %s2564_s14 = sld [smem:[#allocation17_spill]]  ;;  %25 = sbr.rel (!%p23_p10) target bundleno = 12 (0xc), region = 151 }
 0xa66   :  { %1509 = vsyncpa [#allocation5], 1 }
 0xa67   :  { %1511 = vsyncpa [#allocation5 + $0x1], 1 }

</bundles_post_ra>
